<compile_context>
chip_gen: v7x
topology: tpu7x:2x2x1
jax: 0.10.0
libtpu: 0.0.40
codegen_flags: <defaults>
</compile_context>

<pallas_src>
import functools

import jax
import jax.numpy as jnp
from jax import lax
from jax.experimental import pallas as pl
from jax.experimental.pallas import tpu as pltpu

EPS = 1e-5
_NEG_BIG = -1e30


def _round_up(x, m):
    return ((x + m - 1) // m) * m


def _protocon_mden_kernel(*refs, inv_neg_temp, add_uniformity, col_padded):
    """Accumulate, per row tile, across column tiles:
         m_ref  : running row-wise max of dot over real columns
         den_ref: running sum_j n_mask * exp((dot - m) / neg_temp), rescaled online
    """
    if col_padded:
        q_ref, k_ref, lab_r_ref, lab_c_ref, cvalid_ref, m_ref, den_ref = refs
    else:
        q_ref, k_ref, lab_r_ref, lab_c_ref, m_ref, den_ref = refs

    j = pl.program_id(1)

    @pl.when(j == 0)
    def _init():
        m_ref[...] = jnp.full_like(m_ref, _NEG_BIG)
        den_ref[...] = jnp.zeros_like(den_ref)

    # Gram tile on the MXU (bf16 inputs, f32 accumulation).
    dot = jnp.einsum("md,nd->mn", q_ref[...], k_ref[...],
                     preferred_element_type=jnp.float32)          # (tm, tn) f32

    # Single online row max over real columns (shared by both temperatures,
    # since max commutes with positive scaling) -> one XLU reduction.
    if col_padded:
        valid = cvalid_ref[...] != 0                              # (1, tn) bool
        row_max = jnp.max(jnp.where(valid, dot, _NEG_BIG), axis=1, keepdims=True)
    else:
        row_max = jnp.max(dot, axis=1, keepdims=True)
    m_prev = m_ref[...]
    m_new = jnp.maximum(m_prev, row_max)

    # Negatives mask.  With posdot/poscnt hoisted to the wrapper this is the
    # only mask left.  For add_uniformity=False the diagonal is excluded
    # automatically (a sample always shares its own label).
    if add_uniformity:
        tm = q_ref.shape[0]
        tn = k_ref.shape[0]
        i = pl.program_id(0)
        row_ids = i * tm + lax.broadcasted_iota(jnp.int32, (tm, 1), 0)
        col_ids = j * tn + lax.broadcasted_iota(jnp.int32, (1, tn), 1)
        n_mask = row_ids != col_ids                               # exclude self
    else:
        n_mask = lab_r_ref[...] != lab_c_ref[...]                 # (tm, tn) bool
    if col_padded:
        n_mask = n_mask & valid

    # Mask BEFORE the exp: exp(_NEG_BIG) == 0, so masked / padded columns can
    # never produce inf (padded features give dot == 0, which could otherwise
    # overflow exp((0 - m) / neg_temp) when m is very negative).
    shifted = jnp.where(n_mask, (dot - m_new) * inv_neg_temp, _NEG_BIG)
    tile_den = jnp.sum(jnp.exp(shifted), axis=1, keepdims=True)   # XLU reduction

    den_ref[...] = den_ref[...] * jnp.exp((m_prev - m_new) * inv_neg_temp) + tile_den
    m_ref[...] = m_new


def protocon_loss_pallas(features, labels, *, num_classes, temp=0.1,
                         neg_temp=0.07, add_uniformity=False,
                         tm=512, tn=256, matmul_dtype=jnp.bfloat16,
                         vmem_limit_bytes=40 * 1024 * 1024):
    """ProtoConLoss forward (add_pos_proto / add_neg_proto disabled).

    features: (bs, dim) float.  labels: (bs,) int in [0, num_classes) or -1;
    all -1 ("unlabeled") samples are bucketed together, matching the
    reference's label-equality semantics.  Returns the scalar loss.
    """
    n, d = features.shape
    labels = jnp.reshape(labels, (-1,)).astype(jnp.int32)

    # ---- tile selection ----------------------------------------------------
    d_pad = _round_up(d, 128)
    tn = min(int(tn), _round_up(n, 128))
    tn = max(128, (tn // 128) * 128)                       # lane-aligned columns
    tm = max(tn, (min(int(tm), _round_up(n, tn)) // tn) * tn)  # multiple of tn
    # Keep >= 2 row tiles when the batch allows it: the "parallel" i-axis is
    # what gets split across v7x's two TensorCores.
    while tm > tn and _round_up(n, tm) // tm < 2:
        tm -= tn
    grid_rows = pl.cdiv(n, tm)
    grid_cols = pl.cdiv(n, tn)          # fully-padded column tiles are skipped
    n_pad = grid_rows * tm              # >= grid_cols * tn because tn | tm
    col_padded = (n % tn) != 0

    # ---- label-only / O(N*D) precompute, hoisted out of the kernel ---------
    f32 = features.astype(jnp.float32)
    f_mx = f32.astype(matmul_dtype) if matmul_dtype is not None else f32
    f_rd = f_mx.astype(jnp.float32)     # matmul-dtype-rounded values, in f32
    # NOTE: assumes labels in [0, num_classes) or -1 (the -1 bucket keeps the
    # reference's "unlabeled samples are mutual positives" behavior).
    seg = jnp.where(labels < 0, num_classes, labels)
    class_sum = jnp.zeros((num_classes + 1, d), jnp.float32).at[seg].add(f_rd)
    class_cnt = jnp.zeros((num_classes + 1,), jnp.float32).at[seg].add(1.0)
    poscnt = class_cnt[seg] - 1.0                                  # (n,)
    # posdot[r] = sum_{j != r, label_j == label_r} dot[r, j]
    #           = f_r . (class_sum[label_r] - f_r)   (exactly 0 for singletons)
    posdot = jnp.sum(f_rd * (class_sum[seg] - f_rd), axis=1)       # (n,)

    # ---- kernel inputs ------------------------------------------------------
    f_k = jnp.pad(f_mx, ((0, n_pad - n), (0, d_pad - d)))  # zero pad: dot unchanged
    lab_pad = jnp.pad(labels, (0, n_pad - n), constant_values=-1)
    lab_rows = lab_pad.reshape(n_pad, 1)                   # row-tile orientation
    lab_cols = lab_pad.reshape(1, n_pad)                   # col-tile orientation

    k_spec_kwargs = {}
    if d_pad <= 256 and grid_cols > 2:
        # Short per-step compute: deepen the K pipeline to hide the fetch.
        k_spec_kwargs["pipeline_mode"] = pl.Buffered(3)

    in_specs = [
        pl.BlockSpec((tm, d_pad), lambda i, j: (i, 0)),                    # Q rows
        pl.BlockSpec((tn, d_pad), lambda i, j: (j, 0), **k_spec_kwargs),   # K cols
        pl.BlockSpec((tm, 1), lambda i, j: (i, 0)),                        # row labels
        pl.BlockSpec((1, tn), lambda i, j: (0, j)),                        # col labels
    ]
    inputs = [f_k, f_k, lab_rows, lab_cols]
    if col_padded:
        # Explicit index-based column validity (no label-sentinel assumption);
        # only needed when n is not a multiple of tn.
        col_valid = (jnp.arange(n_pad, dtype=jnp.int32) < n).astype(jnp.int32)
        inputs.append(col_valid.reshape(1, n_pad))
        in_specs.append(pl.BlockSpec((1, tn), lambda i, j: (0, j)))

    out_spec = pl.BlockSpec((tm, 1), lambda i, j: (i, 0))
    kernel = functools.partial(
        _protocon_mden_kernel,
        inv_neg_temp=float(1.0 / neg_temp),
        add_uniformity=bool(add_uniformity),
        col_padded=bool(col_padded))

    m_out, den_out = pl.pallas_call(
        kernel,
        out_shape=(jax.ShapeDtypeStruct((n_pad, 1), jnp.float32),
                   jax.ShapeDtypeStruct((n_pad, 1), jnp.float32)),
        grid=(grid_rows, grid_cols),
        in_specs=in_specs,
        out_specs=(out_spec, out_spec),
        compiler_params=pltpu.CompilerParams(
            # Row tiles are independent -> "parallel" (megacore sharding); the
            # column axis is the online reduction (outputs accumulate across
            # it) -> "arbitrary".
            dimension_semantics=("parallel", "arbitrary"),
            # 40 MiB scoped VMEM: actual usage is a few MiB even at d_pad=2048
            # and this stays under v7x's 64 MiB physical VMEM per TensorCore.
            vmem_limit_bytes=int(vmem_limit_bytes)),
    )(*inputs)

    # ---- finalize in the wrapper (O(N) work, exact divides) ----------------
    m = m_out[:n, 0]
    den = den_out[:n, 0]
    log_prob_sum = (posdot - poscnt * m) * (1.0 / temp) - poscnt * jnp.log(den + EPS)
    mean_log_prob_pos = log_prob_sum / (poscnt + EPS)
    return -jnp.mean(mean_log_prob_pos)


def protocon_loss_ref(features, labels, *, temp=0.1, neg_temp=0.07,
                      add_uniformity=False, matmul_dtype=None):
    """Pure-JAX reference mirroring the PyTorch forward (pos/neg proto off).

    matmul_dtype=jnp.bfloat16 rounds the matmul inputs the same way the kernel
    does (f32 accumulation), for a dtype-matched comparison."""
    n = features.shape[0]
    f = features.astype(jnp.float32)
    if matmul_dtype is not None:
        f = f.astype(matmul_dtype).astype(jnp.float32)
    lab = labels.reshape(n, 1)
    dot = f @ f.T
    temped_num = dot / temp
    temped_den = dot / neg_temp
    logits_num = temped_num - jnp.max(temped_num, axis=1, keepdims=True)
    logits_den = temped_den - jnp.max(temped_den, axis=1, keepdims=True)
    mask = (lab == lab.T).astype(jnp.float32)
    logits_mask = jnp.ones((n, n), jnp.float32) - jnp.eye(n, dtype=jnp.float32)
    p_mask = mask * logits_mask
    n_mask = logits_mask if add_uniformity else (1.0 - mask)
    exp_logits_den = jnp.exp(logits_den) * n_mask
    log_prob = logits_num - jnp.log(exp_logits_den.sum(1, keepdims=True) + EPS)
    mlpp = (p_mask * log_prob).sum(1) / (p_mask.sum(1) + EPS)
    return -mlpp.mean()


if __name__ == "__main__":
    key = jax.random.PRNGKey(0)
    kf, kl, kp = jax.random.split(key, 3)

    bs, dim, num_classes = 8, 32, 4

    # __init__ parameter setup: prototypes (num_classes, dim), L2-normalized.
    # They only feed the disabled add_pos_proto / add_neg_proto branches.
    prototypes = jax.random.normal(kp, (num_classes, dim), dtype=jnp.float32)
    prototypes = prototypes / (
        jnp.linalg.norm(prototypes, axis=-1, keepdims=True) + 1e-12)

    features = jax.random.normal(kf, (bs, dim), dtype=jnp.float32)
    # Contrastive embeddings are typically L2-normalized; the kernel does not
    # require it, but it keeps this small numerical check well conditioned.
    features = features / jnp.linalg.norm(features, axis=-1, keepdims=True)
    labels = jax.random.randint(kl, (bs,), 0, num_classes, dtype=jnp.int32)

    loss = protocon_loss_pallas(features, labels, num_classes=num_classes)
    loss = jax.block_until_ready(loss)

    # Dtype-matched reference (bf16-rounded matmul inputs, f32 elsewhere).
    ref_matched = protocon_loss_ref(features, labels, matmul_dtype=jnp.bfloat16)
    assert jnp.allclose(loss, ref_matched, rtol=2e-3, atol=2e-3), (loss, ref_matched)

    # Loose sanity check against the full-f32 reference (bf16 MXU inputs are a
    # deliberate precision/perf trade).
    ref_f32 = protocon_loss_ref(features, labels)
    assert jnp.allclose(loss, ref_f32, rtol=1e-1, atol=1e-1), (loss, ref_f32)

    print("KERNEL_OK")
</pallas_src>

<mosaic_0001>
module attributes {stable_mosaic.version = 11 : i64} {
  func.func @_protocon_mden_kernel(%arg0: i32, %arg1: i32, %arg2: memref<128x128xbf16, #tpu.memory_space<vmem>>, %arg3: memref<128x128xbf16, #tpu.memory_space<vmem>>, %arg4: memref<128x1xi32, #tpu.memory_space<vmem>>, %arg5: memref<1x128xi32, #tpu.memory_space<vmem>>, %arg6: memref<1x128xi32, #tpu.memory_space<vmem>>, %arg7: memref<128x1xf32, #tpu.memory_space<vmem>>, %arg8: memref<128x1xf32, #tpu.memory_space<vmem>>) attributes {dimension_semantics = [#tpu.dimension_semantics<parallel>, #tpu.dimension_semantics<arbitrary>], iteration_bounds = array<i64: 1, 1>, scalar_prefetch = 0 : i64, scratch_operands = 0 : i64, tpu.core_type = #tpu.core_type<tc>, window_params = [{transform_indices = @transform_0, window_bounds = array<i64: 128, 128>}, {transform_indices = @transform_1, window_bounds = array<i64: 128, 128>}, {transform_indices = @transform_2, window_bounds = array<i64: 128, 1>}, {transform_indices = @transform_3, window_bounds = array<i64: 1, 128>}, {transform_indices = @transform_4, window_bounds = array<i64: 1, 128>}, {transform_indices = @transform_5, window_bounds = array<i64: 128, 1>}, {transform_indices = @transform_6, window_bounds = array<i64: 128, 1>}]} {
    %c0_i32 = arith.constant 0 : i32
    %0 = arith.cmpi eq, %arg1, %c0_i32 : i32
    %1 = arith.extui %0 : i1 to i32
    %c0_i32_0 = arith.constant 0 : i32
    %2 = arith.cmpi ne, %1, %c0_i32_0 : i32
    scf.if %2 {
      %cst_25 = arith.constant -1.000000e+30 : f32
      %42 = vector.broadcast %cst_25 : f32 to vector<128x1xf32>
      %c0_26 = arith.constant 0 : index
      %c0_27 = arith.constant 0 : index
      %43 = vector.load %arg7[%c0_26, %c0_27] : memref<128x1xf32, #tpu.memory_space<vmem>>, vector<128x1xf32>
      tpu.vector_store %arg7[%c0_26, %c0_27], %42 {strides = array<i32>} : memref<128x1xf32, #tpu.memory_space<vmem>>, vector<128x1xf32>,
      %cst_28 = arith.constant 0.000000e+00 : f32
      %44 = vector.broadcast %cst_28 : f32 to vector<128x1xf32>
      %c0_29 = arith.constant 0 : index
      %c0_30 = arith.constant 0 : index
      %45 = vector.load %arg8[%c0_29, %c0_30] : memref<128x1xf32, #tpu.memory_space<vmem>>, vector<128x1xf32>
      tpu.vector_store %arg8[%c0_29, %c0_30], %44 {strides = array<i32>} : memref<128x1xf32, #tpu.memory_space<vmem>>, vector<128x1xf32>,
    } else {
    }
    %c0 = arith.constant 0 : index
    %c0_1 = arith.constant 0 : index
    %3 = vector.load %arg2[%c0, %c0_1] : memref<128x128xbf16, #tpu.memory_space<vmem>>, vector<128x128xbf16>
    %c0_2 = arith.constant 0 : index
    %c0_3 = arith.constant 0 : index
    %4 = vector.load %arg3[%c0_2, %c0_3] : memref<128x128xbf16, #tpu.memory_space<vmem>>, vector<128x128xbf16>
    "tpu.trace_start"() <{level = 10 : i32, message = "md,nd->mn"}> : () -> ()
    %cst = arith.constant dense<0.000000e+00> : vector<128x128xf32>
    %5 = tpu.matmul %3, %4, %cst {dimension_numbers = #tpu.dot_dimension_numbers<[1], [1], [0], [0], [0, 0, 1, 0], [], []>} : vector<128x128xbf16>, vector<128x128xbf16>, vector<128x128xf32> -> vector<128x128xf32>
    "tpu.trace_stop"() : () -> ()
    %c0_4 = arith.constant 0 : index
    %c0_5 = arith.constant 0 : index
    %6 = vector.load %arg6[%c0_4, %c0_5] : memref<1x128xi32, #tpu.memory_space<vmem>>, vector<1x128xi32>
    %c0_i32_6 = arith.constant 0 : i32
    %7 = vector.broadcast %c0_i32_6 : i32 to vector<1x128xi32>
    %8 = arith.cmpi ne, %6, %7 : vector<1x128xi32>
    %cst_7 = arith.constant -1.000000e+30 : f32
    %9 = vector.shape_cast %8 : vector<1x128xi1> to vector<1x128xi1>
    %10 = vector.broadcast %9 : vector<1x128xi1> to vector<128x128xi1>
    %11 = vector.broadcast %cst_7 : f32 to vector<128x128xf32>
    %12 = arith.select %10, %5, %11 : vector<128x128xi1>, vector<128x128xf32>
    %cst_8 = arith.constant dense<0xFF800000> : vector<128xf32>
    %13 = vector.multi_reduction <maximumf>, %12, %cst_8 [1] : vector<128x128xf32> to vector<128xf32>
    %14 = vector.shape_cast %13 : vector<128xf32> to vector<128x1xf32>
    %c0_9 = arith.constant 0 : index
    %c0_10 = arith.constant 0 : index
    %15 = vector.load %arg7[%c0_9, %c0_10] : memref<128x1xf32, #tpu.memory_space<vmem>>, vector<128x1xf32>
    %16 = arith.maximumf %15, %14 : vector<128x1xf32>
    %c0_11 = arith.constant 0 : index
    %c0_12 = arith.constant 0 : index
    %17 = vector.load %arg4[%c0_11, %c0_12] : memref<128x1xi32, #tpu.memory_space<vmem>>, vector<128x1xi32>
    %c0_13 = arith.constant 0 : index
    %c0_14 = arith.constant 0 : index
    %18 = vector.load %arg5[%c0_13, %c0_14] : memref<1x128xi32, #tpu.memory_space<vmem>>, vector<1x128xi32>
    %19 = vector.broadcast %17 : vector<128x1xi32> to vector<128x128xi32>
    %20 = vector.broadcast %18 : vector<1x128xi32> to vector<128x128xi32>
    %21 = arith.cmpi ne, %19, %20 : vector<128x128xi32>
    %22 = vector.broadcast %8 : vector<1x128xi1> to vector<128x128xi1>
    %23 = arith.andi %21, %22 : vector<128x128xi1>
    %24 = vector.broadcast %16 : vector<128x1xf32> to vector<128x128xf32>
    %25 = arith.subf %5, %24 : vector<128x128xf32>
    %cst_15 = arith.constant 14.2857141 : f32
    %26 = vector.broadcast %cst_15 : f32 to vector<128x128xf32>
    %27 = arith.mulf %25, %26 : vector<128x128xf32>
    %cst_16 = arith.constant -1.000000e+30 : f32
    %28 = vector.broadcast %cst_16 : f32 to vector<128x128xf32>
    %29 = arith.select %23, %27, %28 : vector<128x128xi1>, vector<128x128xf32>
    %30 = math.exp %29 : vector<128x128xf32>
    %cst_17 = arith.constant dense<0.000000e+00> : vector<128xf32>
    %31 = vector.multi_reduction <add>, %30, %cst_17 [1] : vector<128x128xf32> to vector<128xf32>
    %32 = vector.shape_cast %31 : vector<128xf32> to vector<128x1xf32>
    %c0_18 = arith.constant 0 : index
    %c0_19 = arith.constant 0 : index
    %33 = vector.load %arg8[%c0_18, %c0_19] : memref<128x1xf32, #tpu.memory_space<vmem>>, vector<128x1xf32>
    %34 = arith.subf %15, %16 : vector<128x1xf32>
    %cst_20 = arith.constant 14.2857141 : f32
    %35 = vector.broadcast %cst_20 : f32 to vector<128x1xf32>
    %36 = arith.mulf %34, %35 : vector<128x1xf32>
    %37 = math.exp %36 : vector<128x1xf32>
    %38 = arith.mulf %33, %37 : vector<128x1xf32>
    %39 = arith.addf %38, %32 : vector<128x1xf32>
    %c0_21 = arith.constant 0 : index
    %c0_22 = arith.constant 0 : index
    %40 = vector.load %arg8[%c0_21, %c0_22] : memref<128x1xf32, #tpu.memory_space<vmem>>, vector<128x1xf32>
    tpu.vector_store %arg8[%c0_21, %c0_22], %39 {strides = array<i32>} : memref<128x1xf32, #tpu.memory_space<vmem>>, vector<128x1xf32>,
    %c0_23 = arith.constant 0 : index
    %c0_24 = arith.constant 0 : index
    %41 = vector.load %arg7[%c0_23, %c0_24] : memref<128x1xf32, #tpu.memory_space<vmem>>, vector<128x1xf32>
    tpu.vector_store %arg7[%c0_23, %c0_24], %16 {strides = array<i32>} : memref<128x1xf32, #tpu.memory_space<vmem>>, vector<128x1xf32>,
    return
  }
  func.func @transform_0(%arg0: i32, %arg1: i32) -> (i32, i32) {
    %c0_i32 = arith.constant 0 : i32
    %c0_i32_0 = arith.constant 0 : i32
    return %arg0, %c0_i32 : i32, i32
  }
  func.func @transform_1(%arg0: i32, %arg1: i32) -> (i32, i32) {
    %c0_i32 = arith.constant 0 : i32
    %c0_i32_0 = arith.constant 0 : i32
    return %arg1, %c0_i32 : i32, i32
  }
  func.func @transform_2(%arg0: i32, %arg1: i32) -> (i32, i32) {
    %c0_i32 = arith.constant 0 : i32
    %c0_i32_0 = arith.constant 0 : i32
    return %arg0, %c0_i32 : i32, i32
  }
  func.func @transform_3(%arg0: i32, %arg1: i32) -> (i32, i32) {
    %c0_i32 = arith.constant 0 : i32
    %c0_i32_0 = arith.constant 0 : i32
    return %c0_i32, %arg1 : i32, i32
  }
  func.func @transform_4(%arg0: i32, %arg1: i32) -> (i32, i32) {
    %c0_i32 = arith.constant 0 : i32
    %c0_i32_0 = arith.constant 0 : i32
    return %c0_i32, %arg1 : i32, i32
  }
  func.func @transform_5(%arg0: i32, %arg1: i32) -> (i32, i32) {
    %c0_i32 = arith.constant 0 : i32
    %c0_i32_0 = arith.constant 0 : i32
    return %arg0, %c0_i32 : i32, i32
  }
  func.func @transform_6(%arg0: i32, %arg1: i32) -> (i32, i32) {
    %c0_i32 = arith.constant 0 : i32
    %c0_i32_0 = arith.constant 0 : i32
    return %arg0, %c0_i32 : i32, i32
  }
}

</mosaic_0001>

<bundles_post_ra>
// kernel: tpu_custom_call.1
= control target key start
LH: loop header
LB: loop body
LE: loop exit
PB: predicated region body
PF: predicated region fallthrough
CT: control target
= control target key end

     0   :  { %v985_v16 = vmov 0   ;;  %vm27_vm0 = vcmask 7168   ;;  %v986_v17 = vmov -1e+30   ;;  %v288_v18 = vlaneseq  ;;  %s1854_s1 = inlined_call_operand.vmem [shape: bf16[128,128], index: 1, kind: input, shape index: {}]   ;;  %s1855_s0 = inlined_call_operand.vmem [shape: bf16[128,128], index: 0, kind: input, shape index: {}]   ;;  %s1856_s5 = inlined_call_operand.vmem [shape: f32[128,1], index: 5, kind: output, shape index: {0}]   ;;  %s1857_s4 = inlined_call_operand.vmem [shape: s32[1,128], index: 4, kind: input, shape index: {}]   ;;  %s1858_s2 = inlined_call_operand.vmem [shape: s32[128,1], index: 2, kind: input, shape index: {}]   ;;  %s1859_s6 = inlined_call_operand.vmem [shape: f32[128,1], index: 6, kind: output, shape index: {1}]   ;;  %s1860_s3 = inlined_call_operand.vmem [shape: s32[1,128], index: 3, kind: input, shape index: {}]  }
   0x1   :  { %v905_v0 = vld [vmem:[%s1854_s1] sm:$0xff]   ;;  %v906_v1 = vld [vmem:[%s1854_s1 + $0x8] sm:$0xff]   ;;  %v907_v2 = vld [vmem:[%s1854_s1 + $0x10] sm:$0xff]   ;;  %904 = vset.pattern.permute.xlu1 %v985_v16  ;;  %903 = vset.pattern.permute.xlu0 %v985_v16  ;;  %38 = vst.msk [vmem:[%s1856_s5 + $0x50] sm:$0xff] %vm27_vm0, %v986_v17  ;;  %v987_v53 = vmov 0.0  }
   0x2   :  { %852 = vmatprep.subr.bf16.mxu0 %v905_v0  ;;  %884 = vmatprep.subr.bf16.mxu1 %v905_v0  ;;  %v913_v3 = vld [vmem:[%s1855_s0] sm:$0xff]   ;;  %v908_v5 = vld [vmem:[%s1854_s1 + $0x18] sm:$0xff]   ;;  %v910_v7 = vld [vmem:[%s1854_s1 + $0x28] sm:$0xff]   ;;  %28 = vst.msk [vmem:[%s1856_s5] sm:$0xff] %vm27_vm0, %v986_v17  ;;  %v289_v20 = vshrl.u32 %v288_v18, 7 }
   0x3   :  { %853 = vmatpush3.bf16.xpose.msra.mxu0 %v905_v0  ;;  %892 = vmatpush3.bf16.xpose.msra.mxu1 %v905_v0  ;;  %v914_v4 = vld [vmem:[%s1855_s0 + $0x20] sm:$0xff]   ;;  %v911_v8 = vld [vmem:[%s1854_s1 + $0x30] sm:$0xff]   ;;  %v912_v9 = vld [vmem:[%s1854_s1 + $0x38] sm:$0xff]   ;;  %29 = vst.msk [vmem:[%s1856_s5 + $0x8] sm:$0xff] %vm27_vm0, %v986_v17 }
   0x4   :  { %854 = vmatprep.subr.bf16.mxu0 %v906_v1  ;;  %885 = vmatprep.subr.bf16.mxu1 %v906_v1  ;;  %v909_v6 = vld [vmem:[%s1854_s1 + $0x20] sm:$0xff]   ;;  %v915_v10 = vld [vmem:[%s1855_s0 + $0x8] sm:$0xff]   ;;  %v917_v12 = vld [vmem:[%s1855_s0 + $0x10] sm:$0xff]   ;;  %30 = vst.msk [vmem:[%s1856_s5 + $0x10] sm:$0xff] %vm27_vm0, %v986_v17  ;;  %v290_v21 = vsub.s32 0, %v289_v20 }
   0x5   :  { %868 = vmatprep.mubr.bf16.mxu0 %v913_v3  ;;  %876 = vmatprep.mubr.bf16.mxu1 %v914_v4  ;;  %v916_v11 = vld [vmem:[%s1855_s0 + $0x28] sm:$0xff]   ;;  %v919_v13 = vld [vmem:[%s1855_s0 + $0x30] sm:$0xff]   ;;  %v918_v14 = vld [vmem:[%s1855_s0 + $0x18] sm:$0xff]   ;;  %31 = vst.msk [vmem:[%s1856_s5 + $0x18] sm:$0xff] %vm27_vm0, %v986_v17 }
   0x6   :  { %v920_v15 = vld [vmem:[%s1855_s0 + $0x38] sm:$0xff]   ;;  %32 = vst.msk [vmem:[%s1856_s5 + $0x20] sm:$0xff] %vm27_vm0, %v986_v17  ;;  %33 = vst.msk [vmem:[%s1856_s5 + $0x28] sm:$0xff] %vm27_vm0, %v986_v17  ;;  %v285_v19 = vld [vmem:[%s1857_s4] sm:$0x1] }
   0x7   :  { %34 = vst.msk [vmem:[%s1856_s5 + $0x30] sm:$0xff] %vm27_vm0, %v986_v17  ;;  %35 = vst.msk [vmem:[%s1856_s5 + $0x38] sm:$0xff] %vm27_vm0, %v986_v17  ;;  %vm286_vm1 = vcmp.ne.s32.totalorder %v285_v19, 0  ;;  %v374_v52 = vld [vmem:[%s1858_s2 + $0x8] sm:$0xff]  ;;  %v375_v54 = vld [vmem:[%s1858_s2 + $0x10] sm:$0xff] }
   0x8   :  { %36 = vst.msk [vmem:[%s1856_s5 + $0x40] sm:$0xff] %vm27_vm0, %v986_v17  ;;  %37 = vst.msk [vmem:[%s1856_s5 + $0x48] sm:$0xff] %vm27_vm0, %v986_v17  ;;  %v287_v22 = vsel %vm286_vm1, 1, %v985_v16  ;;  %v376_v55 = vld [vmem:[%s1858_s2 + $0x18] sm:$0xff]  ;;  %v377_v56 = vld [vmem:[%s1858_s2 + $0x20] sm:$0xff] }
   0x9   :  { %39 = vst.msk [vmem:[%s1856_s5 + $0x58] sm:$0xff] %vm27_vm0, %v986_v17  ;;  %40 = vst.msk [vmem:[%s1856_s5 + $0x60] sm:$0xff] %vm27_vm0, %v986_v17  ;;  %v1138_v23 = vrot.slane %v287_v22, %v290_v21  ;;  %v379_v57 = vld [vmem:[%s1858_s2 + $0x30] sm:$0xff]  ;;  %v381_v58 = vld [vmem:[%s1858_s2 + $0x40] sm:$0xff] }
   0xa   :  { %41 = vst.msk [vmem:[%s1856_s5 + $0x68] sm:$0xff] %vm27_vm0, %v986_v17  ;;  %42 = vst.msk [vmem:[%s1856_s5 + $0x70] sm:$0xff] %vm27_vm0, %v986_v17  ;;  %v373_v59 = vld [vmem:[%s1858_s2] sm:$0xff]  ;;  %v383_v60 = vld [vmem:[%s1858_s2 + $0x50] sm:$0xff] }
   0xb   :  { %855 = vmatpush3.bf16.xpose.msra.mxu0 %v906_v1  ;;  %893 = vmatpush3.bf16.xpose.msra.mxu1 %v906_v1  ;;  %43 = vst.msk [vmem:[%s1856_s5 + $0x78] sm:$0xff] %vm27_vm0, %v986_v17  ;;  %vm292_vm2 = vcmp.eq.s32.totalorder %v1138_v23, 1  ;;  %46 = vst.msk [vmem:[%s1859_s6 + $0x10] sm:$0xff] %vm27_vm0, %v987_v53  ;;  %v378_v61 = vld [vmem:[%s1858_s2 + $0x28] sm:$0xff]  ;;  %v385_v62 = vld [vmem:[%s1858_s2 + $0x60] sm:$0xff] }
   0xc   :  { %856 = vmatprep.subr.bf16.mxu0 %v907_v2  ;;  %886 = vmatprep.subr.bf16.mxu1 %v907_v2  ;;  %44 = vst.msk [vmem:[%s1859_s6] sm:$0xff] %vm27_vm0, %v987_v53  ;;  %45 = vst.msk [vmem:[%s1859_s6 + $0x8] sm:$0xff] %vm27_vm0, %v987_v53  ;;  %v380_v63 = vld [vmem:[%s1858_s2 + $0x38] sm:$0xff]  ;;  %v382_v0 = vld [vmem:[%s1858_s2 + $0x48] sm:$0xff] }
   0xd   :  { %47 = vst.msk [vmem:[%s1859_s6 + $0x18] sm:$0xff] %vm27_vm0, %v987_v53  ;;  %48 = vst.msk [vmem:[%s1859_s6 + $0x20] sm:$0xff] %vm27_vm0, %v987_v53  ;;  %v384_v1 = vld [vmem:[%s1858_s2 + $0x58] sm:$0xff]  ;;  %v1612_v22 = vld [vmem:[%s1860_s3] ss:$0 sm:$0xff] }
   0xe   :  { %49 = vst.msk [vmem:[%s1859_s6 + $0x28] sm:$0xff] %vm27_vm0, %v987_v53  ;;  %50 = vst.msk [vmem:[%s1859_s6 + $0x30] sm:$0xff] %vm27_vm0, %v987_v53 }
   0xf   :  { %51 = vst.msk [vmem:[%s1859_s6 + $0x38] sm:$0xff] %vm27_vm0, %v987_v53  ;;  %52 = vst.msk [vmem:[%s1859_s6 + $0x40] sm:$0xff] %vm27_vm0, %v987_v53  ;;  %v1378_v21 = vld [vmem:[%s1856_s5 + $0x40] sm:$0xff] }
  0x10   :  { %53 = vst.msk [vmem:[%s1859_s6 + $0x48] sm:$0xff] %vm27_vm0, %v987_v53  ;;  %54 = vst.msk [vmem:[%s1859_s6 + $0x50] sm:$0xff] %vm27_vm0, %v987_v53 }
  0x11   :  { %55 = vst.msk [vmem:[%s1859_s6 + $0x58] sm:$0xff] %vm27_vm0, %v987_v53  ;;  %56 = vst.msk [vmem:[%s1859_s6 + $0x60] sm:$0xff] %vm27_vm0, %v987_v53 }
  0x12   :  { %57 = vst.msk [vmem:[%s1859_s6 + $0x68] sm:$0xff] %vm27_vm0, %v987_v53  ;;  %58 = vst.msk [vmem:[%s1859_s6 + $0x70] sm:$0xff] %vm27_vm0, %v987_v53 }
  0x13   :  { %857 = vmatpush3.bf16.xpose.msra.mxu0 %v907_v2  ;;  %894 = vmatpush3.bf16.xpose.msra.mxu1 %v907_v2  ;;  %59 = vst.msk [vmem:[%s1859_s6 + $0x78] sm:$0xff] %vm27_vm0, %v987_v53  ;;  %v386_v2 = vld [vmem:[%s1858_s2 + $0x68] sm:$0xff] }
  0x14   :  { %858 = vmatprep.subr.bf16.mxu0 %v908_v5  ;;  %887 = vmatprep.subr.bf16.mxu1 %v908_v5 }
  0x1b   :  { %859 = vmatpush3.bf16.xpose.msra.mxu0 %v908_v5  ;;  %895 = vmatpush3.bf16.xpose.msra.mxu1 %v908_v5 }
  0x1c   :  { %860 = vmatprep.subr.bf16.mxu0 %v909_v6  ;;  %888 = vmatprep.subr.bf16.mxu1 %v909_v6 }
  0x23   :  { %861 = vmatpush3.bf16.xpose.msra.mxu0 %v909_v6  ;;  %896 = vmatpush3.bf16.xpose.msra.mxu1 %v909_v6 }
  0x24   :  { %862 = vmatprep.subr.bf16.mxu0 %v910_v7  ;;  %889 = vmatprep.subr.bf16.mxu1 %v910_v7 }
  0x2b   :  { %863 = vmatpush3.bf16.xpose.msra.mxu0 %v910_v7  ;;  %897 = vmatpush3.bf16.xpose.msra.mxu1 %v910_v7  ;;  %v1330_v7 = vld [vmem:[%s1856_s5 + $0x50] sm:$0xff] }
  0x2c   :  { %864 = vmatprep.subr.bf16.mxu0 %v911_v8  ;;  %890 = vmatprep.subr.bf16.mxu1 %v911_v8 }
  0x33   :  { %865 = vmatpush3.bf16.xpose.msra.mxu0 %v911_v8  ;;  %898 = vmatpush3.bf16.xpose.msra.mxu1 %v911_v8  ;;  %v1335_v8 = vld [vmem:[%s1856_s5 + $0x10] sm:$0xff] }
  0x34   :  { %866 = vmatprep.subr.bf16.mxu0 %v912_v9  ;;  %891 = vmatprep.subr.bf16.mxu1 %v912_v9 }
  0x3b   :  { %867 = vmatpush3.bf16.xpose.msra.mxu0 %v912_v9  ;;  %899 = vmatpush3.bf16.xpose.msra.mxu1 %v912_v9 }
  0x42   :  { %869 = vmatmul.mubr.bf16.vlgmr.msra.gmra.mrb[0].mxu0 %v915_v10  ;;  %877 = vmatmul.mubr.bf16.vlgmr.msra.gmra.mrb[0].mxu1 %v916_v11 }
  0x43   :  { %872 = vmatprep.mubr.bf16.mxu0 %v917_v12  ;;  %880 = vmatprep.mubr.bf16.mxu1 %v919_v13  ;;  %v1346_v13 = vld [vmem:[%s1856_s5] sm:$0xff] }
  0x4a   :  { %873 = vmatmul.mubr.bf16.gmra.mrb[4].mxu0 %v918_v14  ;;  %881 = vmatmul.mubr.bf16.gmra.mrb[4].mxu1 %v920_v15  ;;  %v1351_v14 = vld [vmem:[%s1856_s5 + $0x18] sm:$0xff] }
 0x115   :  { %v1141_v24 = vpop.f32.mrb[0].mxu0  ;;  %v1143_v25 = vpop.f32.mrb[0].mxu1 }
 0x116   :  { %v1145_v26 = vpop.f32.mrb[1].mxu0  ;;  %v303_v27 = vsel %vm292_vm2, %v1143_v25, -1e+30  ;;  %v295_v28 = vsel %vm292_vm2, %v1141_v24, -1e+30  ;;  %v1153_v29 = vpop.f32.mrb[1].mxu1 }
 0x117   :  { %329 = vmax.xlane.f32.xlu0 %v303_v27  ;;  %313 = vmax.xlane.f32.xlu1 %v295_v28  ;;  %v1155_v30 = vpop.f32.mrb[2].mxu0  ;;  %v1157_v31 = vpop.f32.mrb[2].mxu1  ;;  %v293_v34 = vsel %vm292_vm2, %v1145_v26, -1e+30  ;;  %v301_v38 = vsel %vm292_vm2, %v1153_v29, -1e+30 }
 0x118   :  { %v1159_v32 = vpop.f32.mrb[3].mxu0  ;;  %v1161_v33 = vpop.f32.mrb[3].mxu1  ;;  %v296_v35 = vsel %vm292_vm2, %v1155_v30, -1e+30  ;;  %v304_v39 = vsel %vm292_vm2, %v1157_v31, -1e+30 }
 0x119   :  { %v302_v46 = vsel %vm292_vm2, %v1161_v33, -1e+30  ;;  %v294_v47 = vsel %vm292_vm2, %v1159_v32, -1e+30  ;;  %v1398_v28 = vld [vmem:[%s1856_s5 + $0x58] sm:$0xff] }
 0x11b   :  { %309 = vmax.xlane.f32.xlu0 %v293_v34  ;;  %315 = vmax.xlane.f32.xlu1 %v296_v35 }
 0x11d   :  { %v1169_v36 = vpop.f32.mrb[4].mxu0  ;;  %v1171_v37 = vpop.f32.mrb[4].mxu1 }
 0x11e   :  { %v1179_v40 = vpop.f32.mrb[5].mxu0  ;;  %v1181_v41 = vpop.f32.mrb[5].mxu1  ;;  %v299_v48 = vsel %vm292_vm2, %v1169_v36, -1e+30  ;;  %v307_v49 = vsel %vm292_vm2, %v1171_v37, -1e+30 }
 0x11f   :  { %325 = vmax.xlane.f32.xlu0 %v301_v38  ;;  %331 = vmax.xlane.f32.xlu1 %v304_v39  ;;  %v1183_v42 = vpop.f32.mrb[6].mxu0  ;;  %v1185_v43 = vpop.f32.mrb[6].mxu1  ;;  %v297_v50 = vsel %vm292_vm2, %v1179_v40, -1e+30  ;;  %v305_v51 = vsel %vm292_vm2, %v1181_v41, -1e+30 }
 0x120   :  { %v1187_v44 = vpop.f32.mrb[7].mxu0  ;;  %v1189_v45 = vpop.f32.mrb[7].mxu1  ;;  %v300_v3 = vsel %vm292_vm2, %v1183_v42, -1e+30  ;;  %v308_v4 = vsel %vm292_vm2, %v1185_v43, -1e+30 }
 0x121   :  { %v298_v5 = vsel %vm292_vm2, %v1187_v44, -1e+30  ;;  %v306_v6 = vsel %vm292_vm2, %v1189_v45, -1e+30 }
 0x123   :  { %327 = vmax.xlane.f32.xlu1 %v302_v46  ;;  %311 = vmax.xlane.f32.xlu0 %v294_v47  ;;  %v1409_v46 = vld [vmem:[%s1856_s5 + $0x48] sm:$0xff] }
 0x124   :  { %v1414_v47 = vld [vmem:[%s1856_s5 + $0x8] sm:$0xff] }
 0x127   :  { %321 = vmax.xlane.f32.xlu0 %v299_v48  ;;  %v1579_v48 = vld [vmem:[%s1856_s5 + $0x68] sm:$0xff] }
 0x128   :  { %1877 = vst [vmem:[#allocation9_spill] sm:$0xff] %v1579_v48 }
 0x12b   :  { %337 = vmax.xlane.f32.xlu0 %v307_v49 }
 0x12f   :  { %317 = vmax.xlane.f32.xlu0 %v297_v50 }
 0x133   :  { %333 = vmax.xlane.f32.xlu0 %v305_v51 }
 0x134   :  { %394 = vperm.xlu1 %904, %v374_v52  }
 0x138   :  { %397 = vperm.xlu1 %904, %v375_v54   ;;  %v1561_v54 = vld [vmem:[%s1856_s5 + $0x28] sm:$0xff] }
 0x139   :  { %1875 = vst [vmem:[#allocation7_spill] sm:$0xff] %v1561_v54 }
 0x13c   :  { %400 = vperm.xlu1 %904, %v376_v55  }
 0x140   :  { %403 = vperm.xlu1 %904, %v377_v56   ;;  %v1456_v56 = vld [vmem:[%s1856_s5 + $0x30] sm:$0xff] }
 0x144   :  { %409 = vperm.xlu1 %904, %v379_v57  }
 0x148   :  { %415 = vperm.xlu1 %904, %v381_v58  }
 0x149   :  { %391 = vperm.xlu0 %903, %v373_v59   ;;  %v1464_v59 = vld [vmem:[%s1856_s5 + $0x70] sm:$0xff] }
 0x14a   :  { %1870 = vst [vmem:[#allocation2_spill] sm:$0xff] %v1464_v59 }
 0x14c   :  { %421 = vperm.xlu1 %904, %v383_v60  }
 0x14d   :  { %406 = vperm.xlu0 %903, %v378_v61  }
 0x150   :  { %427 = vperm.xlu1 %904, %v385_v62  }
 0x151   :  { %412 = vperm.xlu0 %903, %v380_v63   ;;  %v1481_v63 = vld [vmem:[%s1856_s5 + $0x20] sm:$0xff] }
 0x155   :  { %418 = vperm.xlu0 %903, %v382_v0  }
 0x159   :  { %424 = vperm.xlu0 %903, %v384_v1  }
 0x15d   :  { %430 = vperm.xlu0 %903, %v386_v2  }
 0x174   :  { %323 = vmax.xlane.f32.xlu1 %v300_v3  ;;  %v1498_v3 = vld [vmem:[%s1856_s5 + $0x60] sm:$0xff] }
 0x178   :  { %339 = vmax.xlane.f32.xlu1 %v308_v4  ;;  %v387_v4 = vld [vmem:[%s1858_s2 + $0x70] sm:$0xff] }
 0x17c   :  { %319 = vmax.xlane.f32.xlu1 %v298_v5 }
 0x180   :  { %335 = vmax.xlane.f32.xlu1 %v306_v6 }
 0x1a4   :  { %v330_v9 = vpop.xlane.xlu0 %329  ;;  %v314_v10 = vpop.xlane.xlu1 %313 }
 0x1a5   :  { %v1338_v11 = vmax.f32 %v1330_v7, %v330_v9  ;;  %v1341_v12 = vmax.f32 %v1335_v8, %v314_v10  ;;  %v388_v10 = vld [vmem:[%s1858_s2 + $0x78] sm:$0xff] }
 0x1a6   :  { %v1545_v9 = vld [vmem:[%s1856_s5 + $0x78] sm:$0xff] }
 0x1a7   :  { %805 = vst.msk [vmem:[%s1856_s5 + $0x50] sm:$0xff] %vm27_vm0, %v1338_v11  ;;  %797 = vst.msk [vmem:[%s1856_s5 + $0x10] sm:$0xff] %vm27_vm0, %v1341_v12  ;;  %526 = vperm.xlu0 %903, %v1338_v11   ;;  %486 = vperm.xlu1 %904, %v1341_v12  }
 0x1a8   :  { %v310_v17 = vpop.xlane.xlu0 %309  ;;  %v316_v18 = vpop.xlane.xlu1 %315  ;;  %1873 = vst [vmem:[#allocation5_spill] sm:$0xff] %v1545_v9 }
 0x1a9   :  { %v1370_v19 = vmax.f32 %v1346_v13, %v310_v17  ;;  %v1373_v20 = vmax.f32 %v1351_v14, %v316_v18 }
 0x1ab   :  { %795 = vst.msk [vmem:[%s1856_s5] sm:$0xff] %vm27_vm0, %v1370_v19  ;;  %798 = vst.msk [vmem:[%s1856_s5 + $0x18] sm:$0xff] %vm27_vm0, %v1373_v20  ;;  %476 = vperm.xlu1 %904, %v1370_v19  }
 0x1ac   :  { %v326_v34 = vpop.xlane.xlu0 %325  ;;  %v332_v35 = vpop.xlane.xlu1 %331 }
 0x1ad   :  { %v1401_v38 = vmax.f32 %v1378_v21, %v326_v34  ;;  %v1404_v39 = vmax.f32 %v1398_v28, %v332_v35 }
 0x1af   :  { %803 = vst.msk [vmem:[%s1856_s5 + $0x40] sm:$0xff] %vm27_vm0, %v1401_v38  ;;  %516 = vperm.xlu0 %903, %v1401_v38   ;;  %491 = vperm.xlu1 %904, %v1373_v20   ;;  %806 = vst.msk [vmem:[%s1856_s5 + $0x58] sm:$0xff] %vm27_vm0, %v1404_v39 }
 0x1b0   :  { %v328_v50 = vpop.xlane.xlu1 %327  ;;  %v312_v51 = vpop.xlane.xlu0 %311 }
 0x1b1   :  { %v1433_v52 = vmax.f32 %v1409_v46, %v328_v50  ;;  %v1436_v53 = vmax.f32 %v1414_v47, %v312_v51 }
 0x1b3   :  { %804 = vst.msk [vmem:[%s1856_s5 + $0x48] sm:$0xff] %vm27_vm0, %v1433_v52  ;;  %796 = vst.msk [vmem:[%s1856_s5 + $0x8] sm:$0xff] %vm27_vm0, %v1436_v53  ;;  %531 = vperm.xlu1 %904, %v1404_v39  }
 0x1b4   :  { %v322_v57 = vpop.xlane.xlu0 %321  ;;  %v1522_v17 = vpop.permute.xlu1 %394 }
 0x1b5   :  { %v1459_v58 = vmax.f32 %v1456_v56, %v322_v57  ;;  %vm443_vm15 = vcmp.ne.s32.totalorder %v1522_v17, %v1612_v22 }
 0x1b7   :  { %481 = vperm.xlu1 %904, %v1436_v53   ;;  %801 = vst.msk [vmem:[%s1856_s5 + $0x30] sm:$0xff] %vm27_vm0, %v1459_v58  ;;  %506 = vperm.xlu0 %903, %v1459_v58  }
 0x1b8   :  { %v338_v61 = vpop.xlane.xlu0 %337  ;;  %v398_v18 = vpop.permute.xlu1 %397 }
 0x1b9   :  { %v1476_v62 = vmax.f32 %v1464_v59, %v338_v61  ;;  %vm444_vm3 = vcmp.ne.s32.totalorder %v398_v18, %v1612_v22 }
 0x1ba   :  { %vm460_vm5 = vmand %vm444_vm3, %vm292_vm2 }
 0x1bb   :  { %1871 = vst [vmem:[#allocation3_spill] sm:$0xff] %v1476_v62  ;;  %809 = vst.msk [vmem:[%s1856_s5 + $0x70] sm:$0xff] %vm27_vm0, %v1476_v62  ;;  %521 = vperm.xlu1 %904, %v1433_v52   ;;  %546 = vperm.xlu0 %903, %v1476_v62  }
 0x1bc   :  { %v318_v1 = vpop.xlane.xlu0 %317  ;;  %v1524_v34 = vpop.permute.xlu1 %400 }
 0x1bd   :  { %v1493_v2 = vmax.f32 %v1481_v63, %v318_v1  ;;  %v1537_v1 = vld [vmem:[%s1856_s5 + $0x38] sm:$0xff]  ;;  %vm445_vm9 = vcmp.ne.s32.totalorder %v1524_v34, %v1612_v22 }
 0x1be   :  { %vm461_vm11 = vmand %vm445_vm9, %vm292_vm2 }
 0x1bf   :  { %799 = vst.msk [vmem:[%s1856_s5 + $0x20] sm:$0xff] %vm27_vm0, %v1493_v2  ;;  %496 = vperm.xlu0 %903, %v1493_v2  }
 0x1c0   :  { %v334_v5 = vpop.xlane.xlu0 %333  ;;  %v1526_v35 = vpop.permute.xlu1 %403 }
 0x1c1   :  { %v1509_v6 = vmax.f32 %v1498_v3, %v334_v5 }
 0x1c3   :  { %807 = vst.msk [vmem:[%s1856_s5 + $0x60] sm:$0xff] %vm27_vm0, %v1509_v6  ;;  %536 = vperm.xlu0 %903, %v1509_v6  }
 0x1c4   :  { %v1528_v50 = vpop.permute.xlu1 %409 }
 0x1c5   :  { %vm448_vm1 = vcmp.ne.s32.totalorder %v1528_v50, %v1612_v22 }
 0x1c7   :  { %436 = vperm.xlu0 %903, %v388_v10  }
 0x1c8   :  { %v1530_v51 = vpop.permute.xlu1 %415  ;;  %v392_v0 = vpop.permute.xlu0 %391 }
 0x1c9   :  { %vm442_vm6 = vcmp.ne.s32.totalorder %v392_v0, %v1612_v22  ;;  %vm450_vm10 = vcmp.ne.s32.totalorder %v1530_v51, %v1612_v22 }
 0x1ca   :  { %vm458_vm8 = vmand %vm442_vm6, %vm292_vm2 }
 0x1cb   :  { %vm466_vm13 = vmand %vm450_vm10, %vm292_vm2 }
 0x1cc   :  { %v422_v57 = vpop.permute.xlu1 %421  ;;  %v1571_v55 = vpop.permute.xlu0 %406 }
 0x1cd   :  { %vm452_vm4 = vcmp.ne.s32.totalorder %v422_v57, %v1612_v22 }
 0x1ce   :  { %vm468_vm7 = vmand %vm452_vm4, %vm292_vm2 }
 0x1cf   :  { %vm459_vm4 = vmand %vm443_vm15, %vm292_vm2 }
 0x1d0   :  { %v1532_v61 = vpop.permute.xlu1 %427  ;;  %v1592_v15 = vpop.permute.xlu0 %412 }
 0x1d1   :  { %vm454_vm9 = vcmp.ne.s32.totalorder %v1532_v61, %v1612_v22 }
 0x1d2   :  { %vm470_vm10 = vmand %vm454_vm9, %vm292_vm2 }
 0x201   :  { %v324_v5 = vpop.xlane.xlu1 %323 }
 0x202   :  { %v1540_v10 = vmax.f32 %v1537_v1, %v324_v5 }
 0x204   :  { %1872 = vst [vmem:[#allocation4_spill] sm:$0xff] %v1540_v10  ;;  %802 = vst.msk [vmem:[%s1856_s5 + $0x38] sm:$0xff] %vm27_vm0, %v1540_v10  ;;  %511 = vperm.xlu1 %904, %v1540_v10  }
 0x205   :  { %v340_v60 = vpop.xlane.xlu1 %339 }
 0x206   :  { %v1556_v5 = vmax.f32 %v1545_v9, %v340_v60 }
 0x208   :  { %1874 = vst [vmem:[#allocation6_spill] sm:$0xff] %v1556_v5  ;;  %810 = vst.msk [vmem:[%s1856_s5 + $0x78] sm:$0xff] %vm27_vm0, %v1556_v5  ;;  %551 = vperm.xlu1 %904, %v1556_v5  }
 0x209   :  { %v320_v60 = vpop.xlane.xlu1 %319 }
 0x20a   :  { %v1574_v49 = vmax.f32 %v1561_v54, %v320_v60 }
 0x20c   :  { %1876 = vst [vmem:[#allocation8_spill] sm:$0xff] %v1574_v49  ;;  %800 = vst.msk [vmem:[%s1856_s5 + $0x28] sm:$0xff] %vm27_vm0, %v1574_v49  ;;  %501 = vperm.xlu1 %904, %v1574_v49  }
 0x20d   :  { %v336_v27 = vpop.xlane.xlu1 %335 }
 0x20e   :  { %v1590_v60 = vmax.f32 %v1579_v48, %v336_v27  ;;  %v1605_v27 = vpop.permute.xlu0 %418 }
 0x20f   :  { %vm451_vm3 = vcmp.ne.s32.totalorder %v1605_v27, %v1612_v22 }
 0x210   :  { %1878 = vst [vmem:[#allocation10_spill] sm:$0xff] %v1590_v60  ;;  %808 = vst.msk [vmem:[%s1856_s5 + $0x68] sm:$0xff] %vm27_vm0, %v1590_v60  ;;  %541 = vperm.xlu1 %904, %v1590_v60  }
 0x211   :  { %vm467_vm6 = vmand %vm451_vm3, %vm292_vm2 }
 0x212   :  { %v425_v16 = vpop.permute.xlu0 %424 }
 0x213   :  { %vm453_vm12 = vcmp.ne.s32.totalorder %v425_v16, %v1612_v22 }
 0x214   :  { %433 = vperm.xlu1 %904, %v387_v4   ;;  %vm469_vm14 = vmand %vm453_vm12, %vm292_vm2 }
 0x216   :  { %v1607_v5 = vpop.permute.xlu0 %430 }
 0x217   :  { %vm455_vm15 = vcmp.ne.s32.totalorder %v1607_v5, %v1612_v22 }
 0x218   :  { %vm471_vm3 = vmand %vm455_vm15, %vm292_vm2 }
 0x226   :  { %v527_v9 = vpop.permute.xlu0 %526  ;;  %v487_v62 = vpop.permute.xlu1 %486 }
 0x227   :  { %v564_v59 = vsub.f32 %v1143_v25, %v527_v9  ;;  %v556_v4 = vsub.f32 %v1141_v24, %v487_v62 }
 0x229   :  { %v580_v60 = vmul.f32 14.285714, %v564_v59  ;;  %v572_v48 = vmul.f32 14.285714, %v556_v4 }
 0x22a   :  { %v477_v49 = vpop.permute.xlu1 %476 }
 0x22b   :  { %v596_v18 = vsel %vm468_vm7, %v580_v60, -1e+30  ;;  %v588_v54 = vsel %vm460_vm5, %v572_v48, -1e+30  ;;  %v554_v10 = vsub.f32 %v1145_v26, %v477_v49  ;;  %vm464_vm5 = vmand %vm448_vm1, %vm292_vm2  ;;  %vm446_vm7 = vcmp.ne.s32.totalorder %v1526_v35, %v1612_v22 }
 0x22c   :  { %v606_v25 = vmul.f32 1.442695, %v588_v54  ;;  %v622_v59 = vmul.f32 1.442695, %v596_v18 }
 0x22d   :  { %v570_v24 = vmul.f32 14.285714, %v554_v10 }
 0x22e   :  { %v517_v62 = vpop.permute.xlu0 %516  ;;  %v492_v0 = vpop.permute.xlu1 %491  ;;  %921 = vpow2.f32 %v606_v25 }
 0x22f   :  { %v586_v9 = vsel %vm458_vm8, %v570_v24, -1e+30  ;;  %v562_v48 = vsub.f32 %v1153_v29, %v517_v62  ;;  %v557_v26 = vsub.f32 %v1155_v30, %v492_v0  ;;  %vm462_vm8 = vmand %vm446_vm7, %vm292_vm2 }
 0x230   :  { %v602_v49 = vmul.f32 1.442695, %v586_v9 }
 0x231   :  { %v578_v54 = vmul.f32 14.285714, %v562_v48  ;;  %v573_v34 = vmul.f32 14.285714, %v557_v26 }
 0x232   :  { %923 = vpow2.f32 %v602_v49  ;;  %v532_v51 = vpop.permute.xlu1 %531 }
 0x233   :  { %925 = vpow2.f32 %v622_v59  ;;  %v594_v57 = vsel %vm466_vm13, %v578_v54, -1e+30  ;;  %v589_v10 = vsel %vm461_vm11, %v573_v34, -1e+30  ;;  %v565_v29 = vsub.f32 %v1157_v31, %v532_v51 }
 0x234   :  { %v618_v30 = vmul.f32 1.442695, %v594_v57  ;;  %v608_v60 = vmul.f32 1.442695, %v589_v10  ;;  %vm449_vm11 = vcmp.ne.s32.totalorder %v1592_v15, %v1612_v22  ;;  %vm447_vm13 = vcmp.ne.s32.totalorder %v1571_v55, %v1612_v22 }
 0x235   :  { %v581_v4 = vmul.f32 14.285714, %v565_v29  ;;  %vm465_vm12 = vmand %vm449_vm11, %vm292_vm2 }
 0x236   :  { %927 = vpow2.f32 %v618_v30  ;;  %v482_v16 = vpop.permute.xlu1 %481  ;;  %v507_v25 = vpop.permute.xlu0 %506 }
 0x237   :  { %929 = vpow2.f32 %v608_v60  ;;  %v597_v18 = vsel %vm469_vm14, %v581_v4, -1e+30  ;;  %v555_v24 = vsub.f32 %v1159_v32, %v482_v16  ;;  %v560_v59 = vsub.f32 %v1169_v36, %v507_v25  ;;  %vm463_vm14 = vmand %vm447_vm13, %vm292_vm2 }
 0x238   :  { %v624_v31 = vmul.f32 1.442695, %v597_v18  ;;  %v922_v62 = vpop.eup %921 }
 0x239   :  { %v571_v0 = vmul.f32 14.285714, %v555_v24  ;;  %v576_v17 = vmul.f32 14.285714, %v560_v59  ;;  %638 = vadd.xlane.f32.xlu0 %v922_v62 }
 0x23a   :  { %931 = vpow2.f32 %v624_v31  ;;  %v522_v9 = vpop.permute.xlu1 %521  ;;  %v1652_v50 = vpop.permute.xlu0 %546 }
 0x23b   :  { %v587_v32 = vsel %vm459_vm4, %v571_v0, -1e+30  ;;  %v563_v36 = vsub.f32 %v1161_v33, %v522_v9  ;;  %v592_v27 = vsel %vm464_vm5, %v576_v17, -1e+30  ;;  %v568_v49 = vsub.f32 %v1171_v37, %v1652_v50 }
 0x23c   :  { %v924_v48 = vpop.eup %923  ;;  %v604_v26 = vmul.f32 1.442695, %v587_v32  ;;  %v614_v34 = vmul.f32 1.442695, %v592_v27 }
 0x23d   :  { %v926_v54 = vpop.eup %925  ;;  %v579_v51 = vmul.f32 14.285714, %v563_v36  ;;  %634 = vadd.xlane.f32.xlu1 %v924_v48  ;;  %v584_v5 = vmul.f32 14.285714, %v568_v49 }
 0x23e   :  { %933 = vpow2.f32 %v604_v26  ;;  %654 = vadd.xlane.f32.xlu0 %v926_v54  ;;  %v497_v10 = vpop.permute.xlu0 %496 }
 0x23f   :  { %v595_v57 = vsel %vm467_vm6, %v579_v51, -1e+30  ;;  %v558_v30 = vsub.f32 %v1179_v40, %v497_v10  ;;  %935 = vpow2.f32 %v614_v34 }
 0x240   :  { %v928_v29 = vpop.eup %927  ;;  %v620_v33 = vmul.f32 1.442695, %v595_v57 }
 0x241   :  { %v930_v60 = vpop.eup %929  ;;  %v574_v4 = vmul.f32 14.285714, %v558_v30 }
 0x242   :  { %937 = vpow2.f32 %v620_v33  ;;  %650 = vadd.xlane.f32.xlu0 %v928_v29  ;;  %640 = vadd.xlane.f32.xlu1 %v930_v60  ;;  %v537_v16 = vpop.permute.xlu0 %536 }
 0x243   :  { %v590_v25 = vsel %vm462_vm8, %v574_v4, -1e+30  ;;  %v566_v35 = vsub.f32 %v1181_v41, %v537_v16 }
 0x244   :  { %v932_v18 = vpop.eup %931  ;;  %v610_v24 = vmul.f32 1.442695, %v590_v25 }
 0x245   :  { %v582_v31 = vmul.f32 14.285714, %v566_v35 }
 0x246   :  { %656 = vadd.xlane.f32.xlu1 %v932_v18  ;;  %939 = vpow2.f32 %v610_v24  ;;  %v437_v57 = vpop.permute.xlu0 %436  ;;  %v1880_v24 = vsub.f32 %v1346_v13, %v1370_v19  ;;  %v1885_v19 = vsub.f32 %v1414_v47, %v1436_v53  ;;  %v666_v53 = vld [vmem:[%s1859_s6] sm:$0xff] }
 0x247   :  { %v598_v59 = vsel %vm470_vm10, %v582_v31, -1e+30  ;;  %vm457_vm1 = vcmp.ne.s32.totalorder %v437_v57, %v1612_v22 }
 0x248   :  { %v934_v40 = vpop.eup %933  ;;  %v626_v62 = vmul.f32 1.442695, %v598_v59  ;;  %vm473_vm4 = vmand %vm457_vm1, %vm292_vm2  ;;  %v698_v31 = vmul.f32 14.285714, %v1880_v24 }
 0x249   :  { %636 = vadd.xlane.f32.xlu0 %v934_v40  ;;  %v936_v0 = vpop.eup %935  ;;  %v1881_v40 = vsub.f32 %v1330_v7, %v1338_v11  ;;  %v1884_v7 = vsub.f32 %v1398_v28, %v1404_v39  ;;  %v1887_v28 = vsub.f32 %v1456_v56, %v1459_v58  ;;  %v1888_v56 = vsub.f32 %v1481_v63, %v1493_v2  ;;  %v669_v63 = vld [vmem:[%s1859_s6 + $0x18] sm:$0xff] }
 0x24a   :  { %941 = vpow2.f32 %v626_v62 }
 0x24b   :  { %v708_v59 = vmul.f32 14.285714, %v1881_v40  ;;  %v709_v11 = vmul.f32 14.285714, %v1884_v7  ;;  %v704_v39 = vmul.f32 14.285714, %v1887_v28 }
 0x24c   :  { %v938_v17 = vpop.eup %937  ;;  %v702_v58 = vmul.f32 14.285714, %v1888_v56  ;;  %v1890_v28 = vld [vmem:[#allocation4_spill] sm:$0xff] }
 0x24d   :  { %646 = vadd.xlane.f32.xlu0 %v936_v0  ;;  %652 = vadd.xlane.f32.xlu1 %v938_v17  ;;  %v714_v0 = vmul.f32 1.442695, %v698_v31  ;;  %v1882_v17 = vsub.f32 %v1351_v14, %v1373_v20  ;;  %v699_v14 = vmul.f32 14.285714, %v1885_v19  ;;  %v736_v20 = vmul.f32 1.442695, %v709_v11 }
 0x24e   :  { %v670_v11 = vld [vmem:[%s1859_s6 + $0x20] sm:$0xff] }
 0x250   :  { %v940_v61 = vpop.eup %939 }
 0x251   :  { %642 = vadd.xlane.f32.xlu0 %v940_v61  ;;  %v701_v61 = vmul.f32 14.285714, %v1882_v17 }
 0x254   :  { %v942_v9 = vpop.eup %941 }
 0x255   :  { %658 = vadd.xlane.f32.xlu0 %v942_v9  ;;  %v734_v9 = vmul.f32 1.442695, %v708_v59 }
 0x283   :  { %v512_v41 = vpop.permute.xlu1 %511 }
 0x284   :  { %v561_v32 = vsub.f32 %v1183_v42, %v512_v41  ;;  %v720_v41 = vmul.f32 1.442695, %v701_v61 }
 0x286   :  { %v577_v36 = vmul.f32 14.285714, %v561_v32 }
 0x287   :  { %v552_v48 = vpop.permute.xlu1 %551 }
 0x288   :  { %v593_v27 = vsel %vm465_vm12, %v577_v36, -1e+30  ;;  %v569_v34 = vsub.f32 %v1185_v43, %v552_v48  ;;  %v668_v36 = vld [vmem:[%s1859_s6 + $0x10] sm:$0xff]  ;;  %v716_v48 = vmul.f32 1.442695, %v699_v14 }
 0x289   :  { %v616_v26 = vmul.f32 1.442695, %v593_v27 }
 0x28a   :  { %v585_v10 = vmul.f32 14.285714, %v569_v34  ;;  %v726_v34 = vmul.f32 1.442695, %v704_v39  ;;  %v1891_v39 = vsub.f32 %v1537_v1, %v1890_v28 }
 0x28b   :  { %943 = vpow2.f32 %v616_v26  ;;  %v502_v54 = vpop.permute.xlu1 %501 }
 0x28c   :  { %v559_v51 = vsub.f32 %v1187_v44, %v502_v54  ;;  %v601_v30 = vsel %vm473_vm4, %v585_v10, -1e+30 }
 0x28d   :  { %v632_v18 = vmul.f32 1.442695, %v601_v30 }
 0x28e   :  { %v575_v15 = vmul.f32 14.285714, %v559_v51 }
 0x28f   :  { %v542_v42 = vpop.permute.xlu1 %541 }
 0x290   :  { %v591_v29 = vsel %vm463_vm14, %v575_v15, -1e+30  ;;  %v567_v33 = vsub.f32 %v1189_v45, %v542_v42 }
 0x291   :  { %v612_v55 = vmul.f32 1.442695, %v591_v29 }
 0x292   :  { %v583_v43 = vmul.f32 14.285714, %v567_v33 }
 0x293   :  { %945 = vpow2.f32 %v612_v55  ;;  %v434_v44 = vpop.permute.xlu1 %433 }
 0x294   :  { %v599_v60 = vsel %vm471_vm3, %v583_v43, -1e+30  ;;  %vm456_vm5 = vcmp.ne.s32.totalorder %v434_v44, %v1612_v22  ;;  %v1879_v22 = vsub.f32 %v1335_v8, %v1341_v12  ;;  %v1883_v8 = vsub.f32 %v1378_v21, %v1401_v38  ;;  %v674_v43 = vld [vmem:[%s1859_s6 + $0x40] sm:$0xff] }
 0x295   :  { %v944_v4 = vpop.eup %943  ;;  %v628_v45 = vmul.f32 1.442695, %v599_v60  ;;  %vm472_vm6 = vmand %vm456_vm5, %vm292_vm2  ;;  %v1886_v21 = vsub.f32 %v1409_v46, %v1433_v52  ;;  %v676_v52 = vld [vmem:[%s1859_s6 + $0x50] sm:$0xff]  ;;  %v722_v44 = vmul.f32 1.442695, %v702_v58 }
 0x296   :  { %v600_v16 = vsel %vm472_vm6, %v584_v5, -1e+30  ;;  %648 = vadd.xlane.f32.xlu1 %v944_v4  ;;  %v700_v23 = vmul.f32 14.285714, %v1879_v22  ;;  %v706_v12 = vmul.f32 14.285714, %v1883_v8  ;;  %v1889_v5 = vsub.f32 %v1498_v3, %v1509_v6 }
 0x297   :  { %947 = vpow2.f32 %v628_v45  ;;  %v630_v25 = vmul.f32 1.442695, %v600_v16  ;;  %v707_v38 = vmul.f32 14.285714, %v1886_v21  ;;  %v677_v3 = vld [vmem:[%s1859_s6 + $0x58] sm:$0xff] }
 0x298   :  { %v718_v62 = vmul.f32 1.442695, %v700_v23  ;;  %v730_v13 = vmul.f32 1.442695, %v706_v12  ;;  %v710_v30 = vmul.f32 14.285714, %v1889_v5 }
 0x299   :  { %949 = vpow2.f32 %v630_v25  ;;  %v732_v54 = vmul.f32 1.442695, %v707_v38 }
 0x29a   :  { %951 = vpow2.f32 %v632_v18 }
 0x29b   :  { %953 = vpow2.f32 %v718_v62  ;;  %v672_v62 = vld [vmem:[%s1859_s6 + $0x30] sm:$0xff] }
 0x29c   :  { %955 = vpow2.f32 %v714_v0  ;;  %v675_v0 = vld [vmem:[%s1859_s6 + $0x48] sm:$0xff] }
 0x29d   :  { %v946_v35 = vpop.eup %945  ;;  %957 = vpow2.f32 %v734_v9 }
 0x29e   :  { %644 = vadd.xlane.f32.xlu1 %v946_v35  ;;  %959 = vpow2.f32 %v720_v41  ;;  %v738_v35 = vmul.f32 1.442695, %v710_v30 }
 0x29f   :  { %961 = vpow2.f32 %v730_v13 }
 0x2a0   :  { %963 = vpow2.f32 %v736_v20 }
 0x2a1   :  { %v948_v37 = vpop.eup %947  ;;  %965 = vpow2.f32 %v716_v48 }
 0x2a2   :  { %660 = vadd.xlane.f32.xlu1 %v948_v37  ;;  %967 = vpow2.f32 %v732_v54 }
 0x2a3   :  { %v950_v50 = vpop.eup %949  ;;  %969 = vpow2.f32 %v726_v34  ;;  %v1895_v34 = vld [vmem:[#allocation9_spill] sm:$0xff] }
 0x2a4   :  { %662 = vadd.xlane.f32.xlu0 %v950_v50  ;;  %v952_v49 = vpop.eup %951  ;;  %971 = vpow2.f32 %v722_v44  ;;  %v673_v44 = vld [vmem:[%s1859_s6 + $0x38] sm:$0xff] }
 0x2a5   :  { %v954_v32 = vpop.eup %953  ;;  %973 = vpow2.f32 %v738_v35 }
 0x2a6   :  { %664 = vadd.xlane.f32.xlu1 %v952_v49  ;;  %v956_v27 = vpop.eup %955  ;;  %v748_v47 = vmul.f32 %v954_v32, %v668_v36  ;;  %v667_v49 = vld [vmem:[%s1859_s6 + $0x8] sm:$0xff]  ;;  %v678_v32 = vld [vmem:[%s1859_s6 + $0x60] sm:$0xff] }
 0x2a7   :  { %v958_v26 = vpop.eup %957  ;;  %v746_v57 = vmul.f32 %v956_v27, %v666_v53  ;;  %v705_v27 = vmul.f32 14.285714, %v1891_v39  ;;  %v1892_v53 = vld [vmem:[#allocation7_spill] sm:$0xff] }
 0x2a8   :  { %v960_v15 = vpop.eup %959  ;;  %v756_v42 = vmul.f32 %v958_v26, %v676_v52  ;;  %v1893_v26 = vld [vmem:[#allocation8_spill] sm:$0xff] }
 0x2a9   :  { %v962_v29 = vpop.eup %961  ;;  %v749_v4 = vmul.f32 %v960_v15, %v669_v63  ;;  %v1894_v54 = vsub.f32 %v1892_v53, %v1893_v26  ;;  %v1899_v15 = vld [vmem:[#allocation3_spill] sm:$0xff] }
 0x2aa   :  { %v754_v60 = vmul.f32 %v962_v29, %v674_v43  ;;  %v964_v45 = vpop.eup %963  ;;  %v1901_v29 = vld [vmem:[#allocation5_spill] sm:$0xff] }
 0x2ab   :  { %v966_v37 = vpop.eup %965  ;;  %v757_v50 = vmul.f32 %v964_v45, %v677_v3 }
 0x2ac   :  { %v968_v24 = vpop.eup %967  ;;  %v747_v31 = vmul.f32 %v966_v37, %v667_v49 }
 0x2ad   :  { %v970_v40 = vpop.eup %969  ;;  %v755_v9 = vmul.f32 %v968_v24, %v675_v0  ;;  %v681_v24 = vld [vmem:[%s1859_s6 + $0x78] sm:$0xff] }
 0x2ae   :  { %v752_v61 = vmul.f32 %v970_v40, %v672_v62  ;;  %v972_v41 = vpop.eup %971 }
 0x2af   :  { %v750_v19 = vmul.f32 %v972_v41, %v670_v11  ;;  %v974_v14 = vpop.eup %973 }
 0x2b0   :  { %v758_v38 = vmul.f32 %v974_v14, %v678_v32 }
 0x2c6   :  { %v639_v46 = vpop.xlane.xlu0 %638 }
 0x2c7   :  { %v764_v51 = vadd.f32 %v748_v47, %v639_v46  ;;  %v728_v47 = vmul.f32 1.442695, %v705_v27  ;;  %v703_v46 = vmul.f32 14.285714, %v1894_v54 }
 0x2c9   :  { %781 = vst.msk [vmem:[%s1859_s6 + $0x10] sm:$0xff] %vm27_vm0, %v764_v51  ;;  %975 = vpow2.f32 %v728_v47  ;;  %v724_v52 = vmul.f32 1.442695, %v703_v46  ;;  %v1896_v51 = vld [vmem:[#allocation10_spill] sm:$0xff] }
 0x2ca   :  { %v635_v10 = vpop.xlane.xlu1 %634  ;;  %v1897_v56 = vsub.f32 %v1895_v34, %v1896_v51 }
 0x2cb   :  { %v655_v33 = vpop.xlane.xlu0 %654  ;;  %v762_v55 = vadd.f32 %v746_v57, %v635_v10  ;;  %v1898_v57 = vld [vmem:[#allocation2_spill] sm:$0xff]  ;;  %977 = vpow2.f32 %v724_v52 }
 0x2cc   :  { %v772_v2 = vadd.f32 %v756_v42, %v655_v33  ;;  %v711_v58 = vmul.f32 14.285714, %v1897_v56  ;;  %v1900_v42 = vsub.f32 %v1898_v57, %v1899_v15  ;;  %v1902_v33 = vld [vmem:[#allocation6_spill] sm:$0xff] }
 0x2cd   :  { %779 = vst.msk [vmem:[%s1859_s6] sm:$0xff] %vm27_vm0, %v762_v55  ;;  %v1903_v55 = vsub.f32 %v1901_v29, %v1902_v33 }
 0x2ce   :  { %789 = vst.msk [vmem:[%s1859_s6 + $0x50] sm:$0xff] %vm27_vm0, %v772_v2  ;;  %v712_v10 = vmul.f32 14.285714, %v1900_v42  ;;  %v740_v43 = vmul.f32 1.442695, %v711_v58 }
 0x2cf   :  { %v651_v16 = vpop.xlane.xlu0 %650  ;;  %v641_v18 = vpop.xlane.xlu1 %640  ;;  %v713_v1 = vmul.f32 14.285714, %v1903_v55 }
 0x2d0   :  { %v770_v6 = vadd.f32 %v754_v60, %v651_v16  ;;  %v765_v25 = vadd.f32 %v749_v4, %v641_v18  ;;  %v742_v2 = vmul.f32 1.442695, %v712_v10  ;;  %979 = vpow2.f32 %v740_v43  ;;  %v671_v16 = vld [vmem:[%s1859_s6 + $0x28] sm:$0xff] }
 0x2d1   :  { %v744_v5 = vmul.f32 1.442695, %v713_v1 }
 0x2d2   :  { %787 = vst.msk [vmem:[%s1859_s6 + $0x40] sm:$0xff] %vm27_vm0, %v770_v6  ;;  %782 = vst.msk [vmem:[%s1859_s6 + $0x18] sm:$0xff] %vm27_vm0, %v765_v25  ;;  %981 = vpow2.f32 %v742_v2  ;;  %v679_v25 = vld [vmem:[%s1859_s6 + $0x68] sm:$0xff] }
 0x2d3   :  { %v657_v22 = vpop.xlane.xlu1 %656  ;;  %v976_v63 = vpop.eup %975  ;;  %983 = vpow2.f32 %v744_v5 }
 0x2d4   :  { %v773_v23 = vadd.f32 %v757_v50, %v657_v22  ;;  %v753_v30 = vmul.f32 %v976_v63, %v673_v44  ;;  %v680_v50 = vld [vmem:[%s1859_s6 + $0x70] sm:$0xff] }
 0x2d5   :  { %v978_v45 = vpop.eup %977 }
 0x2d6   :  { %790 = vst.msk [vmem:[%s1859_s6 + $0x58] sm:$0xff] %vm27_vm0, %v773_v23  ;;  %v637_v59 = vpop.xlane.xlu0 %636  ;;  %v751_v18 = vmul.f32 %v978_v45, %v671_v16 }
 0x2d7   :  { %v763_v17 = vadd.f32 %v747_v31, %v637_v59 }
 0x2d9   :  { %780 = vst.msk [vmem:[%s1859_s6 + $0x8] sm:$0xff] %vm27_vm0, %v763_v17 }
 0x2da   :  { %v647_v8 = vpop.xlane.xlu0 %646  ;;  %v653_v12 = vpop.xlane.xlu1 %652 }
 0x2db   :  { %v768_v13 = vadd.f32 %v752_v61, %v647_v8  ;;  %v771_v7 = vadd.f32 %v755_v9, %v653_v12  ;;  %v980_v3 = vpop.eup %979 }
 0x2dc   :  { %v982_v37 = vpop.eup %981  ;;  %v759_v49 = vmul.f32 %v980_v3, %v679_v25 }
 0x2dd   :  { %785 = vst.msk [vmem:[%s1859_s6 + $0x30] sm:$0xff] %vm27_vm0, %v768_v13  ;;  %788 = vst.msk [vmem:[%s1859_s6 + $0x48] sm:$0xff] %vm27_vm0, %v771_v7  ;;  %v984_v22 = vpop.eup %983  ;;  %v760_v40 = vmul.f32 %v982_v37, %v680_v50 }
 0x2de   :  { %v643_v20 = vpop.xlane.xlu0 %642  ;;  %v761_v0 = vmul.f32 %v984_v22, %v681_v24 }
 0x2df   :  { %v766_v21 = vadd.f32 %v750_v19, %v643_v20 }
 0x2e1   :  { %783 = vst.msk [vmem:[%s1859_s6 + $0x20] sm:$0xff] %vm27_vm0, %v766_v21 }
 0x2e2   :  { %v659_v36 = vpop.xlane.xlu0 %658 }
 0x2e3   :  { %v774_v48 = vadd.f32 %v758_v38, %v659_v36 }
 0x2e5   :  { %791 = vst.msk [vmem:[%s1859_s6 + $0x60] sm:$0xff] %vm27_vm0, %v774_v48 }
 0x323   :  { %v649_v60 = vpop.xlane.xlu1 %648 }
 0x324   :  { %v769_v4 = vadd.f32 %v753_v30, %v649_v60 }
 0x326   :  { %786 = vst.msk [vmem:[%s1859_s6 + $0x38] sm:$0xff] %vm27_vm0, %v769_v4 }
 0x32b   :  { %v645_v6 = vpop.xlane.xlu1 %644 }
 0x32c   :  { %v767_v35 = vadd.f32 %v751_v18, %v645_v6 }
 0x32e   :  { %784 = vst.msk [vmem:[%s1859_s6 + $0x28] sm:$0xff] %vm27_vm0, %v767_v35 }
 0x32f   :  { %v661_v23 = vpop.xlane.xlu1 %660 }
 0x330   :  { %v775_v31 = vadd.f32 %v759_v49, %v661_v23 }
 0x331   :  { %v663_v59 = vpop.xlane.xlu0 %662 }
 0x332   :  { %792 = vst.msk [vmem:[%s1859_s6 + $0x68] sm:$0xff] %vm27_vm0, %v775_v31  ;;  %v776_v62 = vadd.f32 %v760_v40, %v663_v59 }
 0x333   :  { %v665_v17 = vpop.xlane.xlu1 %664 }
 0x334   :  { %793 = vst.msk [vmem:[%s1859_s6 + $0x70] sm:$0xff] %vm27_vm0, %v776_v62  ;;  %v777_v61 = vadd.f32 %v761_v0, %v665_v17 }
 0x336   :  { %794 = vst.msk [vmem:[%s1859_s6 + $0x78] sm:$0xff] %vm27_vm0, %v777_v61 }

</bundles_post_ra>
